<compile_context>
chip_gen: v7x
topology: tpu7x:2x2x1
jax: 0.10.0
libtpu: 0.0.40
codegen_flags: <defaults>
</compile_context>

<pallas_src>
import jax
import jax.numpy as jnp
from jax import lax
from jax.experimental import pallas as pl
from jax.experimental.pallas import tpu as pltpu


def _round_up(x, m):
    return ((x + m - 1) // m) * m


def _pick_tiles(m, n, k):
    # Block constraints: second-to-last dims multiple of 8, last dims multiple
    # of 128.  tn is both a sublane dim (W block) and a lane dim (out block),
    # so it must be a multiple of 128.
    tm = min(256, _round_up(m, 8))
    tn = min(256, _round_up(n, 128))
    tk = min(512, _round_up(k, 128))
    return tm, tn, tk


# --------------------------------------------------------------------------
# Kernel 1: sample W = mu + exp(log_sigma) * eps   (elementwise, VPU + EUP)
# --------------------------------------------------------------------------
def sample_weight_kernel(mu_ref, ls_ref, eps_ref, w_ref):
    w_ref[...] = (mu_ref[...] + jnp.exp(ls_ref[...]) * eps_ref[...]).astype(w_ref.dtype)


# --------------------------------------------------------------------------
# Kernel 2: y = x @ W^T + (bias_mu + exp(bias_log_sigma) * bias_eps)
# --------------------------------------------------------------------------
def bayes_matmul_kernel(x_ref, w_ref, bmu_ref, bls_ref, beps_ref, o_ref, acc_ref):
    @pl.when(pl.program_id(2) == 0)
    def _():
        acc_ref[...] = jnp.zeros_like(acc_ref)

    # x tile (tm, tk) contracted against W tile (tn, tk) on dim 1 of both:
    # no explicit transpose, f32 accumulation on the MXU.
    acc_ref[...] += lax.dot_general(
        x_ref[...], w_ref[...],
        dimension_numbers=(((1,), (1,)), ((), ())),
        preferred_element_type=jnp.float32,
    )

    @pl.when(pl.program_id(2) == pl.num_programs(2) - 1)
    def _():
        # Bias reparameterization is tiny ((1, tn)) -> sample it at finalize.
        b = bmu_ref[...] + jnp.exp(bls_ref[...]) * beps_ref[...]
        o_ref[...] = (acc_ref[...] + b).astype(o_ref.dtype)


def bayesian_linear_forward(x, weight_mu, weight_log_sigma, weight_eps,
                            bias_mu, bias_log_sigma, bias_eps):
    """x: [..., in_features]; returns [..., out_features]."""
    out_features, in_features = weight_mu.shape
    lead_shape = x.shape[:-1]
    x2d = x.reshape(-1, in_features)
    m = x2d.shape[0]

    tm, tn, tk = _pick_tiles(m, out_features, in_features)
    m_pad = _round_up(m, tm)
    n_pad = _round_up(out_features, tn)
    k_pad = _round_up(in_features, tk)

    # Zero-pad to tile multiples (zeros contribute nothing to the matmul and
    # padded output columns are sliced off below).
    x_p = jnp.pad(x2d, ((0, m_pad - m), (0, k_pad - in_features)))
    wmu_p = jnp.pad(weight_mu, ((0, n_pad - out_features), (0, k_pad - in_features)))
    wls_p = jnp.pad(weight_log_sigma, ((0, n_pad - out_features), (0, k_pad - in_features)))
    weps_p = jnp.pad(weight_eps, ((0, n_pad - out_features), (0, k_pad - in_features)))
    bmu_p = jnp.pad(bias_mu.reshape(1, -1), ((0, 0), (0, n_pad - out_features)))
    bls_p = jnp.pad(bias_log_sigma.reshape(1, -1), ((0, 0), (0, n_pad - out_features)))
    beps_p = jnp.pad(bias_eps.reshape(1, -1), ((0, 0), (0, n_pad - out_features)))

    # ---- Kernel 1: sample weights once (exp work is K*N, not (M/tm)*K*N) ----
    w_spec = pl.BlockSpec((tn, tk), lambda j, kk: (j, kk))
    w_sampled = pl.pallas_call(
        sample_weight_kernel,
        out_shape=jax.ShapeDtypeStruct((n_pad, k_pad), jnp.float32),
        grid_spec=pltpu.PrefetchScalarGridSpec(
            num_scalar_prefetch=0,
            grid=(n_pad // tn, k_pad // tk),
            in_specs=[w_spec, w_spec, w_spec],
            out_specs=w_spec,
        ),
        compiler_params=pltpu.CompilerParams(
            dimension_semantics=("parallel", "parallel")),
    )(wmu_p, wls_p, weps_p)

    # ---- Kernel 2: tiled matmul + bias, K axis last ("arbitrary") ----
    bias_spec = pl.BlockSpec((1, tn), lambda i, j, kk: (0, j))
    out_pad = pl.pallas_call(
        bayes_matmul_kernel,
        out_shape=jax.ShapeDtypeStruct((m_pad, n_pad), x.dtype),
        grid_spec=pltpu.PrefetchScalarGridSpec(
            num_scalar_prefetch=0,
            grid=(m_pad // tm, n_pad // tn, k_pad // tk),
            in_specs=[
                pl.BlockSpec((tm, tk), lambda i, j, kk: (i, kk)),   # x
                pl.BlockSpec((tn, tk), lambda i, j, kk: (j, kk)),   # sampled W
                bias_spec, bias_spec, bias_spec,                    # bias mu/ls/eps
            ],
            out_specs=pl.BlockSpec((tm, tn), lambda i, j, kk: (i, j)),
            scratch_shapes=[pltpu.VMEM((tm, tn), jnp.float32)],
        ),
        compiler_params=pltpu.CompilerParams(
            dimension_semantics=("parallel", "parallel", "arbitrary")),
    )(x_p, w_sampled, bmu_p, bls_p, beps_p)

    out = out_pad[:m, :out_features]
    return out.reshape(*lead_shape, out_features)


def _reference(x, weight_mu, weight_log_sigma, weight_eps,
               bias_mu, bias_log_sigma, bias_eps):
    w = weight_mu + jnp.exp(weight_log_sigma) * weight_eps
    b = bias_mu + jnp.exp(bias_log_sigma) * bias_eps
    return jnp.einsum("...i,oi->...o", x, w) + b


if __name__ == "__main__":
    key = jax.random.PRNGKey(0)

    def make_case(key, batch, seq, in_features, out_features):
        k_x, k_wmu, k_bmu, k_weps, k_beps = jax.random.split(key, 5)
        weight_mu = 0.1 * jax.random.normal(k_wmu, (out_features, in_features), jnp.float32)
        weight_log_sigma = jnp.full((out_features, in_features), -3.0, jnp.float32)
        bias_mu = 0.1 * jax.random.normal(k_bmu, (out_features,), jnp.float32)
        bias_log_sigma = jnp.full((out_features,), -3.0, jnp.float32)
        # torch.randn_like noise generated as plain JAX glue (keeps the
        # reparameterization semantics identical to the PyTorch module).
        weight_eps = jax.random.normal(k_weps, (out_features, in_features), jnp.float32)
        bias_eps = jax.random.normal(k_beps, (out_features,), jnp.float32)
        x = jax.random.normal(k_x, (batch, seq, in_features), jnp.float32)
        return (x, weight_mu, weight_log_sigma, weight_eps,
                bias_mu, bias_log_sigma, bias_eps)

    k1, k2 = jax.random.split(key)

    # Primary small case (consistent with the module's per-timestep linear).
    args1 = make_case(k1, batch=2, seq=8, in_features=32, out_features=16)
    y1 = jax.block_until_ready(bayesian_linear_forward(*args1))
    y1_ref = _reference(*args1)
    assert y1.shape == (2, 8, 16)
    assert jnp.allclose(y1, y1_ref, atol=1e-5, rtol=1e-5)

    # Secondary case with non-aligned dims to exercise padding / multi-tile grid.
    args2 = make_case(k2, batch=3, seq=7, in_features=200, out_features=130)
    y2 = jax.block_until_ready(bayesian_linear_forward(*args2))
    y2_ref = _reference(*args2)
    assert y2.shape == (3, 7, 130)
    assert jnp.allclose(y2, y2_ref, atol=1e-4, rtol=1e-4)

    # TODO(synk): kl_loss() (scalar reduction, training-only) is left to plain JAX.
    # TODO(synk): eps could be generated on-chip with pltpu.prng_* to cut HBM
    # traffic further, but that changes RNG semantics vs torch.randn_like.
    print("KERNEL_OK")
</pallas_src>

<mosaic_0001>
module attributes {stable_mosaic.version = 11 : i64} {
  func.func @sample_weight_kernel(%arg0: i32, %arg1: i32, %arg2: memref<128x128xf32, #tpu.memory_space<vmem>>, %arg3: memref<128x128xf32, #tpu.memory_space<vmem>>, %arg4: memref<128x128xf32, #tpu.memory_space<vmem>>, %arg5: memref<128x128xf32, #tpu.memory_space<vmem>>) attributes {dimension_semantics = [#tpu.dimension_semantics<parallel>, #tpu.dimension_semantics<parallel>], iteration_bounds = array<i64: 1, 1>, scalar_prefetch = 0 : i64, scratch_operands = 0 : i64, tpu.core_type = #tpu.core_type<tc>, window_params = [{transform_indices = @transform_0, window_bounds = array<i64: 128, 128>}, {transform_indices = @transform_1, window_bounds = array<i64: 128, 128>}, {transform_indices = @transform_2, window_bounds = array<i64: 128, 128>}, {transform_indices = @transform_3, window_bounds = array<i64: 128, 128>}]} {
    %c0 = arith.constant 0 : index
    %c0_0 = arith.constant 0 : index
    %0 = vector.load %arg2[%c0, %c0_0] : memref<128x128xf32, #tpu.memory_space<vmem>>, vector<128x128xf32>
    %c0_1 = arith.constant 0 : index
    %c0_2 = arith.constant 0 : index
    %1 = vector.load %arg3[%c0_1, %c0_2] : memref<128x128xf32, #tpu.memory_space<vmem>>, vector<128x128xf32>
    %2 = math.exp %1 : vector<128x128xf32>
    %c0_3 = arith.constant 0 : index
    %c0_4 = arith.constant 0 : index
    %3 = vector.load %arg4[%c0_3, %c0_4] : memref<128x128xf32, #tpu.memory_space<vmem>>, vector<128x128xf32>
    %4 = arith.mulf %2, %3 : vector<128x128xf32>
    %5 = arith.addf %0, %4 : vector<128x128xf32>
    %c0_5 = arith.constant 0 : index
    %c0_6 = arith.constant 0 : index
    %6 = vector.load %arg5[%c0_5, %c0_6] : memref<128x128xf32, #tpu.memory_space<vmem>>, vector<128x128xf32>
    tpu.vector_store %arg5[%c0_5, %c0_6], %5 {strides = array<i32>} : memref<128x128xf32, #tpu.memory_space<vmem>>, vector<128x128xf32>,
    return
  }
  func.func @transform_0(%arg0: i32, %arg1: i32) -> (i32, i32) {
    %c0_i32 = arith.constant 0 : i32
    return %arg0, %arg1 : i32, i32
  }
  func.func @transform_1(%arg0: i32, %arg1: i32) -> (i32, i32) {
    %c0_i32 = arith.constant 0 : i32
    return %arg0, %arg1 : i32, i32
  }
  func.func @transform_2(%arg0: i32, %arg1: i32) -> (i32, i32) {
    %c0_i32 = arith.constant 0 : i32
    return %arg0, %arg1 : i32, i32
  }
  func.func @transform_3(%arg0: i32, %arg1: i32) -> (i32, i32) {
    %c0_i32 = arith.constant 0 : i32
    return %arg0, %arg1 : i32, i32
  }
}

</mosaic_0001>

<bundles_post_ra>
// kernel: tpu_custom_call.1
= control target key start
LH: loop header
LB: loop body
LE: loop exit
PB: predicated region body
PF: predicated region fallthrough
CT: control target
= control target key end

     0   :  { %8 = vsyncpa [#allocation3], 0  ;;  %s427_s0 = inlined_call_operand.hbm [shape: f32[128,128], index: 0, kind: input, shape index: {}]   ;;  %s428_s1 = inlined_call_operand.hbm [shape: f32[128,128], index: 1, kind: input, shape index: {}]   ;;  %s429_s2 = inlined_call_operand.hbm [shape: f32[128,128], index: 2, kind: input, shape index: {}]   ;;  %s430_s3 = inlined_call_operand.hbm [shape: f32[128,128], index: 3, kind: output, shape index: {}]  }
   0x1   :  { %9 = vsyncpa [#allocation6], 0 }
   0x2   :  { %10 = vsyncpa [#allocation4], 0  ;;  %s334_s12 = smov [#allocation5]   ;;  %s335_s14 = smov [#allocation2]  }
   0x3   :  { %s28_s13 = sshll.u32 %s334_s12, 4  ;;  %s16_s15 = sshll.u32 %s335_s14, 4  ;;  %s29_s13 = int_to_ptr.vmem [resolvable:$true] %s28_s13  ;;  %s360_s15 = int_to_ptr.vmem [resolvable:$true] %s16_s15 }
   0x4   :  { %s240_s18 = scalar_lea.hbm %s428_s1, 2048 }
   0x5   :  { %p241_p0 = scmp.ne.s32.totalorder %s428_s1, %s240_s18  ;;  %p244_p1 = scmp.lt.u32.totalorder %s240_s18, %s428_s1 }
   0x7   :  { %p246_p2 = pnand %p244_p1, %p241_p0 }
   0x9   :  { %249 = shalt.err (!%p246_p2)
}
   0xa   :  { %s250_s23 = scalar_lea.vmem %s29_s13, 2048  ;;  %p255_p4 = scmp.lt.s32.totalorder %s29_s13, %s29_s13 }
   0xb   :  { %p251_p3 = scmp.ne.s32.totalorder %s29_s13, %s250_s23  ;;  %p256_p5 = scmp.lt.s32.totalorder %s250_s23, %s250_s23 }
   0xd   :  { %p257_p6 = por %p256_p5, %p255_p4 }
   0xf   :  { %p258_p7 = pnand %p257_p6, %p251_p3 }
  0x11   :  { %261 = shalt.err (!%p258_p7)
}
  0x12   :  { %s336_s24 = smov 128   ;;  %s337_s25 = smov 8  }
  0x13   :  { %34 = dma.hbm_to_vmem [thread:$0]  %s428_s1, 2048, %s29_s13, [#allocation6], %s336_s24, %s336_s24, %s337_s25  }
  0x14   :  { %s262_s30 = scalar_lea.hbm %s427_s0, 2048 }
  0x15   :  { %p263_p8 = scmp.ne.s32.totalorder %s427_s0, %s262_s30  ;;  %p266_p9 = scmp.lt.u32.totalorder %s262_s30, %s427_s0 }
  0x17   :  { %p268_p10 = pnand %p266_p9, %p263_p8 }
  0x19   :  { %271 = shalt.err (!%p268_p10)
}
  0x1a   :  { %s272_s8 = scalar_lea.vmem %s360_s15, 2048  ;;  %p277_p12 = scmp.lt.s32.totalorder %s360_s15, %s360_s15 }
  0x1b   :  { %p273_p11 = scmp.ne.s32.totalorder %s360_s15, %s272_s8  ;;  %p278_p13 = scmp.lt.s32.totalorder %s272_s8, %s272_s8 }
  0x1d   :  { %p279_p0 = por %p278_p13, %p277_p12 }
  0x1f   :  { %p280_p1 = pnand %p279_p0, %p273_p11 }
  0x21   :  { %283 = shalt.err (!%p280_p1)
}
  0x22   :  { %22 = dma.hbm_to_vmem [thread:$0]  %s427_s0, 2048, %s360_s15, [#allocation3], %s336_s24, %s336_s24, %s337_s25  }
  0x23   :  { %s338_s10 = smov [#allocation7]   ;;  %s284_s14 = scalar_lea.hbm %s429_s2, 2048 }
  0x24   :  { %s40_s11 = sshll.u32 %s338_s10, 4  ;;  %p285_p2 = scmp.ne.s32.totalorder %s429_s2, %s284_s14  ;;  %s41_s11 = int_to_ptr.vmem [resolvable:$true] %s40_s11 }
  0x25   :  { %p288_p3 = scmp.lt.u32.totalorder %s284_s14, %s429_s2 }
  0x27   :  { %p290_p4 = pnand %p288_p3, %p285_p2 }
  0x29   :  { %293 = shalt.err (!%p290_p4)
}
  0x2a   :  { %s294_s20 = scalar_lea.vmem %s41_s11, 2048  ;;  %p299_p6 = scmp.lt.s32.totalorder %s41_s11, %s41_s11 }
  0x2b   :  { %p295_p5 = scmp.ne.s32.totalorder %s41_s11, %s294_s20  ;;  %p300_p7 = scmp.lt.s32.totalorder %s294_s20, %s294_s20 }
  0x2d   :  { %p301_p8 = por %p300_p7, %p299_p6 }
  0x2f   :  { %p302_p9 = pnand %p301_p8, %p295_p5 }
  0x31   :  { %305 = shalt.err (!%p302_p9)
}
  0x32   :  { %46 = dma.hbm_to_vmem [thread:$0]  %s429_s2, 2048, %s41_s11, [#allocation6], %s336_s24, %s336_s24, %s337_s25  }
  0x33   :  { %328 = dma.done.wait [#allocation3], 2048  }
  0x34   :  { %329 = vsyncadd [#allocation3], 4294965248 }
  0x35   :  { %330 = dma.done.wait [#allocation6], 4096  }
  0x36   :  { %331 = vsyncadd [#allocation6], 4294963200  ;;  %v72_v0 = vld [vmem:[#allocation5] sm:$0xff]  ;;  %v73_v2 = vld [vmem:[#allocation5 + $0x8] sm:$0xff]  ;;  %s339_s2 = smov [#allocation8]  }
  0x37   :  { %v88_v1 = vmul.f32 1.442695, %v72_v0  ;;  %v90_v3 = vmul.f32 1.442695, %v73_v2  ;;  %v74_v4 = vld [vmem:[#allocation5 + $0x10] sm:$0xff]  ;;  %v75_v6 = vld [vmem:[#allocation5 + $0x18] sm:$0xff] }
  0x38   :  { %v92_v5 = vmul.f32 1.442695, %v74_v4  ;;  %v94_v7 = vmul.f32 1.442695, %v75_v6  ;;  %v76_v8 = vld [vmem:[#allocation5 + $0x20] sm:$0xff]  ;;  %v77_v10 = vld [vmem:[#allocation5 + $0x28] sm:$0xff] }
  0x39   :  { %208 = vpow2.f32 %v88_v1  ;;  %v96_v9 = vmul.f32 1.442695, %v76_v8  ;;  %v98_v11 = vmul.f32 1.442695, %v77_v10  ;;  %v78_v12 = vld [vmem:[#allocation5 + $0x30] sm:$0xff]  ;;  %v79_v14 = vld [vmem:[#allocation5 + $0x38] sm:$0xff] }
  0x3a   :  { %210 = vpow2.f32 %v90_v3  ;;  %v100_v13 = vmul.f32 1.442695, %v78_v12  ;;  %v102_v15 = vmul.f32 1.442695, %v79_v14  ;;  %v80_v16 = vld [vmem:[#allocation5 + $0x40] sm:$0xff]  ;;  %v81_v18 = vld [vmem:[#allocation5 + $0x48] sm:$0xff] }
  0x3b   :  { %212 = vpow2.f32 %v92_v5  ;;  %v104_v17 = vmul.f32 1.442695, %v80_v16  ;;  %v106_v19 = vmul.f32 1.442695, %v81_v18  ;;  %v82_v20 = vld [vmem:[#allocation5 + $0x50] sm:$0xff]  ;;  %v120_v21 = vld [vmem:[#allocation7] sm:$0xff] }
  0x3c   :  { %214 = vpow2.f32 %v94_v7  ;;  %v108_v22 = vmul.f32 1.442695, %v82_v20  ;;  %v83_v23 = vld [vmem:[#allocation5 + $0x58] sm:$0xff]  ;;  %v121_v24 = vld [vmem:[#allocation7 + $0x8] sm:$0xff]  ;;  %v84_v26 = vld [vmem:[#allocation5 + $0x60] sm:$0xff]  ;;  %s189_s21 = sshll.u32 %s339_s2, 4  ;;  %s190_s21 = int_to_ptr.vmem [resolvable:$true] %s189_s21 }
  0x3d   :  { %216 = vpow2.f32 %v96_v9  ;;  %v110_v25 = vmul.f32 1.442695, %v83_v23  ;;  %v56_v28 = vld [vmem:[#allocation2] sm:$0xff]  ;;  %v122_v29 = vld [vmem:[#allocation7 + $0x10] sm:$0xff]  ;;  %v112_v30 = vmul.f32 1.442695, %v84_v26  ;;  %p311_p11 = scmp.lt.s32.totalorder %s190_s21, %s190_s21 }
  0x3e   :  { %218 = vpow2.f32 %v98_v11  ;;  %v85_v31 = vld [vmem:[#allocation5 + $0x68] sm:$0xff]  ;;  %v123_v35 = vld [vmem:[#allocation7 + $0x18] sm:$0xff]  ;;  %v86_v37 = vld [vmem:[#allocation5 + $0x70] sm:$0xff]  ;;  %s306_s22 = scalar_lea.vmem %s190_s21, 2048 }
  0x3f   :  { %220 = vpow2.f32 %v100_v13  ;;  %v57_v34 = vld [vmem:[#allocation2 + $0x8] sm:$0xff]  ;;  %v114_v36 = vmul.f32 1.442695, %v85_v31  ;;  %v58_v40 = vld [vmem:[#allocation2 + $0x10] sm:$0xff]  ;;  %v124_v41 = vld [vmem:[#allocation7 + $0x20] sm:$0xff]  ;;  %p307_p10 = scmp.ne.s32.totalorder %s190_s21, %s306_s22  ;;  %p312_p12 = scmp.lt.s32.totalorder %s306_s22, %s306_s22 }
  0x40   :  { %222 = vpow2.f32 %v102_v15  ;;  %v116_v42 = vmul.f32 1.442695, %v86_v37  ;;  %v87_v43 = vld [vmem:[#allocation5 + $0x78] sm:$0xff]  ;;  %v125_v48 = vld [vmem:[#allocation7 + $0x28] sm:$0xff]  ;;  %v60_v53 = vld [vmem:[#allocation2 + $0x20] sm:$0xff] }
  0x41   :  { %224 = vpow2.f32 %v104_v17  ;;  %v59_v47 = vld [vmem:[#allocation2 + $0x18] sm:$0xff]  ;;  %v118_v49 = vmul.f32 1.442695, %v87_v43  ;;  %v126_v54 = vld [vmem:[#allocation7 + $0x30] sm:$0xff]  ;;  %v61_v58 = vld [vmem:[#allocation2 + $0x28] sm:$0xff]  ;;  %p313_p13 = por %p312_p12, %p311_p11 }
  0x42   :  { %226 = vpow2.f32 %v106_v19  ;;  %v127_v59 = vld [vmem:[#allocation7 + $0x38] sm:$0xff]  ;;  %v62_v63 = vld [vmem:[#allocation2 + $0x30] sm:$0xff]  ;;  %v128_v0 = vld [vmem:[#allocation7 + $0x40] sm:$0xff] }
  0x43   :  { %v209_v27 = vpop.eup %208  ;;  %228 = vpow2.f32 %v108_v22  ;;  %v63_v4 = vld [vmem:[#allocation2 + $0x38] sm:$0xff]  ;;  %v129_v5 = vld [vmem:[#allocation7 + $0x48] sm:$0xff]  ;;  %v64_v9 = vld [vmem:[#allocation2 + $0x40] sm:$0xff]  ;;  %p314_p0 = pnand %p313_p13, %p307_p10 }
  0x44   :  { %v211_v32 = vpop.eup %210  ;;  %v136_v33 = vmul.f32 %v209_v27, %v120_v21  ;;  %230 = vpow2.f32 %v110_v25  ;;  %v130_v10 = vld [vmem:[#allocation7 + $0x50] sm:$0xff]  ;;  %v65_v14 = vld [vmem:[#allocation2 + $0x48] sm:$0xff]  ;;  %v131_v15 = vld [vmem:[#allocation7 + $0x58] sm:$0xff] }
  0x45   :  { %v213_v38 = vpop.eup %212  ;;  %v137_v39 = vmul.f32 %v211_v32, %v121_v24  ;;  %232 = vpow2.f32 %v112_v30  ;;  %v66_v19 = vld [vmem:[#allocation2 + $0x50] sm:$0xff]  ;;  %v132_v20 = vld [vmem:[#allocation7 + $0x60] sm:$0xff]  ;;  %v67_v24 = vld [vmem:[#allocation2 + $0x58] sm:$0xff] }
  0x46   :  { %v215_v44 = vpop.eup %214  ;;  %v152_v45 = vadd.f32 %v136_v33, %v56_v28  ;;  %v138_v46 = vmul.f32 %v213_v38, %v122_v29  ;;  %234 = vpow2.f32 %v114_v36  ;;  %v133_v25 = vld [vmem:[#allocation7 + $0x68] sm:$0xff]  ;;  %v68_v29 = vld [vmem:[#allocation2 + $0x60] sm:$0xff]  ;;  %v134_v30 = vld [vmem:[#allocation7 + $0x70] sm:$0xff] }
  0x47   :  { %v217_v50 = vpop.eup %216  ;;  %v153_v51 = vadd.f32 %v137_v39, %v57_v34  ;;  %v139_v52 = vmul.f32 %v215_v44, %v123_v35  ;;  %236 = vpow2.f32 %v116_v42  ;;  %v69_v34 = vld [vmem:[#allocation2 + $0x68] sm:$0xff]  ;;  %v135_v35 = vld [vmem:[#allocation7 + $0x78] sm:$0xff]  ;;  %v70_v39 = vld [vmem:[#allocation2 + $0x70] sm:$0xff] }
  0x48   :  { %v219_v55 = vpop.eup %218  ;;  %168 = vst [vmem:[#allocation8] sm:$0xff] %v152_v45  ;;  %v154_v56 = vadd.f32 %v138_v46, %v58_v40  ;;  %v140_v57 = vmul.f32 %v217_v50, %v124_v41  ;;  %238 = vpow2.f32 %v118_v49  ;;  %v71_v43 = vld [vmem:[#allocation2 + $0x78] sm:$0xff] }
  0x49   :  { %v221_v60 = vpop.eup %220  ;;  %169 = vst [vmem:[#allocation8 + $0x8] sm:$0xff] %v153_v51  ;;  %v155_v61 = vadd.f32 %v139_v52, %v59_v47  ;;  %v141_v62 = vmul.f32 %v219_v55, %v125_v48 }
  0x4a   :  { %v223_v1 = vpop.eup %222  ;;  %170 = vst [vmem:[#allocation8 + $0x10] sm:$0xff] %v154_v56  ;;  %v156_v2 = vadd.f32 %v140_v57, %v60_v53  ;;  %v142_v3 = vmul.f32 %v221_v60, %v126_v54 }
  0x4b   :  { %v225_v6 = vpop.eup %224  ;;  %171 = vst [vmem:[#allocation8 + $0x18] sm:$0xff] %v155_v61  ;;  %v157_v7 = vadd.f32 %v141_v62, %v61_v58  ;;  %v143_v8 = vmul.f32 %v223_v1, %v127_v59 }
  0x4c   :  { %v227_v11 = vpop.eup %226  ;;  %172 = vst [vmem:[#allocation8 + $0x20] sm:$0xff] %v156_v2  ;;  %v158_v12 = vadd.f32 %v142_v3, %v62_v63  ;;  %v144_v13 = vmul.f32 %v225_v6, %v128_v0 }
  0x4d   :  { %v229_v16 = vpop.eup %228  ;;  %173 = vst [vmem:[#allocation8 + $0x28] sm:$0xff] %v157_v7  ;;  %v159_v17 = vadd.f32 %v143_v8, %v63_v4  ;;  %v145_v18 = vmul.f32 %v227_v11, %v129_v5 }
  0x4e   :  { %v231_v21 = vpop.eup %230  ;;  %174 = vst [vmem:[#allocation8 + $0x30] sm:$0xff] %v158_v12  ;;  %v160_v22 = vadd.f32 %v144_v13, %v64_v9  ;;  %v146_v23 = vmul.f32 %v229_v16, %v130_v10 }
  0x4f   :  { %v233_v26 = vpop.eup %232  ;;  %175 = vst [vmem:[#allocation8 + $0x38] sm:$0xff] %v159_v17  ;;  %v161_v27 = vadd.f32 %v145_v18, %v65_v14  ;;  %v147_v28 = vmul.f32 %v231_v21, %v131_v15 }
  0x50   :  { %v235_v31 = vpop.eup %234  ;;  %176 = vst [vmem:[#allocation8 + $0x40] sm:$0xff] %v160_v22  ;;  %v162_v32 = vadd.f32 %v146_v23, %v66_v19  ;;  %v148_v33 = vmul.f32 %v233_v26, %v132_v20 }
  0x51   :  { %v237_v36 = vpop.eup %236  ;;  %177 = vst [vmem:[#allocation8 + $0x48] sm:$0xff] %v161_v27  ;;  %v163_v37 = vadd.f32 %v147_v28, %v67_v24  ;;  %v149_v38 = vmul.f32 %v235_v31, %v133_v25 }
  0x52   :  { %v239_v40 = vpop.eup %238  ;;  %178 = vst [vmem:[#allocation8 + $0x50] sm:$0xff] %v162_v32  ;;  %v164_v41 = vadd.f32 %v148_v33, %v68_v29  ;;  %v150_v42 = vmul.f32 %v237_v36, %v134_v30 }
  0x53   :  { %179 = vst [vmem:[#allocation8 + $0x58] sm:$0xff] %v163_v37  ;;  %v165_v44 = vadd.f32 %v149_v38, %v69_v34  ;;  %v151_v45 = vmul.f32 %v239_v40, %v135_v35 }
  0x54   :  { %180 = vst [vmem:[#allocation8 + $0x60] sm:$0xff] %v164_v41  ;;  %v166_v46 = vadd.f32 %v150_v42, %v70_v39 }
  0x55   :  { %181 = vst [vmem:[#allocation8 + $0x68] sm:$0xff] %v165_v44  ;;  %v167_v47 = vadd.f32 %v151_v45, %v71_v43 }
  0x56   :  { %182 = vst [vmem:[#allocation8 + $0x70] sm:$0xff] %v166_v46 }
  0x57   :  { %183 = vst [vmem:[#allocation8 + $0x78] sm:$0xff] %v167_v47 }
  0x58   :  { %317 = shalt.err (!%p314_p0)
}
  0x59   :  { %s318_s27 = scalar_lea.hbm %s430_s3, 2048 }
  0x5a   :  { %p319_p1 = scmp.ne.s32.totalorder %s430_s3, %s318_s27  ;;  %p322_p2 = scmp.lt.u32.totalorder %s318_s27, %s430_s3 }
  0x5c   :  { %p324_p3 = pnand %p322_p2, %p319_p1 }
  0x5e   :  { %327 = shalt.err (!%p324_p3)
}
  0x5f   :  { %195 = dma.vmem_to_hbm [thread:$0]  %s190_s21, 2048, %s430_s3, [#allocation4], %s336_s24, %s336_s24, %s337_s25  }
  0x60   :  { %332 = dma.done.wait [#allocation4], 2048  }
  0x61   :  { %333 = vsyncadd [#allocation4], 4294965248 }
  0x62   :  { %199 = vsyncpa [#allocation3], 1 }
  0x63   :  { %200 = vsyncpa [#allocation6], 1 }
  0x64   :  { %201 = vsyncpa [#allocation4], 1 }

</bundles_post_ra>
